<compile_context>
chip_gen: v7x
topology: tpu7x:2x2x1
jax: 0.10.0
libtpu: 0.0.40
codegen_flags: <defaults>
</compile_context>

<pallas_src>
import jax
import jax.numpy as jnp
from jax.experimental import pallas as pl
from jax.experimental.pallas import tpu as pltpu


# ---------------------------------------------------------------------------
# Kernel 1: fused QKV projection, row-tiled over the flattened (B*N, C) input.
# ---------------------------------------------------------------------------
def _qkv_proj_kernel(x_ref, w_ref, o_ref):
    # x_ref: (rows, C) f32 ; w_ref: (C, 3C) bf16 (q columns pre-scaled)
    # o_ref: (rows, 3C) bf16
    acc = jnp.dot(x_ref[...].astype(jnp.bfloat16), w_ref[...],
                  preferred_element_type=jnp.float32)
    o_ref[...] = acc.astype(o_ref.dtype)


# ---------------------------------------------------------------------------
# Kernel 2: attention core + output projection, one (batch, head) per step.
# Grid = (B, H); H is the inner ("arbitrary") axis carrying the accumulator.
# ---------------------------------------------------------------------------
def _attn_kernel(q_ref, kt_ref, v_ref, wproj_ref, bproj_ref, out_ref, attn_ref,
                 acc_ref):
    h = pl.program_id(1)

    @pl.when(h == 0)
    def _():
        acc_ref[...] = jnp.zeros_like(acc_ref)

    q = q_ref[0, 0]          # (N, hd)  bf16, softmax scale pre-folded
    kt = kt_ref[0, 0]        # (hd, N)  bf16, lane-dense RHS (pre-transposed)
    v = v_ref[0, 0]          # (N, hd)  bf16

    # Scores: q @ k^T with k already transposed -> straight MXU matmul.
    s = jnp.dot(q, kt, preferred_element_type=jnp.float32)       # (N, N) f32

    # Numerically-stable softmax along the key axis.
    s = s - jnp.max(s, axis=-1, keepdims=True)
    p = jnp.exp(s)
    p = p * pl.reciprocal(jnp.sum(p, axis=-1, keepdims=True), approx=True)
    attn_ref[0, 0] = p.astype(attn_ref.dtype)

    # Attention output for this head, then its projected partial (K=hd),
    # accumulated across heads into the resident (N, C) f32 scratch.
    o = jnp.dot(p.astype(jnp.bfloat16), v,
                preferred_element_type=jnp.float32)               # (N, hd) f32
    acc_ref[...] += jnp.dot(o.astype(jnp.bfloat16), wproj_ref[0],
                            preferred_element_type=jnp.float32)   # (N, C) f32

    @pl.when(h == pl.num_programs(1) - 1)
    def _():
        out_ref[0] = (acc_ref[...] + bproj_ref[...]).astype(out_ref.dtype)


# ---------------------------------------------------------------------------
# Wrapper
# ---------------------------------------------------------------------------
def mhsa_forward(x, wqkv, wproj, bproj, *, num_heads, attn_dtype=jnp.float32):
    """x: (B, N, C) f32; wqkv: (3C, C) [torch layout]; wproj: (C, C); bproj: (C,)."""
    B, N, C = x.shape
    H = num_heads
    hd = C // H
    scale = hd ** (-0.5)
    BN = B * N

    # ---- weight prep (once, wrapper-side) ----
    wq_t = wqkv[:C].T * scale                     # fold softmax scale into q
    wkv_t = wqkv[C:].T
    wqkv_t = jnp.concatenate([wq_t, wkv_t], axis=1).astype(jnp.bfloat16)  # (C, 3C)
    wproj_r = wproj.T.reshape(H, hd, C).astype(jnp.bfloat16)              # (H, hd, C)
    bproj_2d = bproj.reshape(1, C).astype(jnp.float32)

    # ---- kernel 1: fused QKV projection over flattened rows ----
    rows = min(1024, BN)
    x2 = x.reshape(BN, C)
    # double-buffered x/w/out blocks, 2x headroom, clamped below v7x physical.
    k1_est = 2 * (rows * C * 4 + C * 3 * C * 2 + rows * 3 * C * 2)
    k1_vmem = int(max(8 << 20, min(56 << 20, 2 * k1_est)))
    cost_qkv = pl.CostEstimate(
        flops=2 * BN * C * 3 * C,
        transcendentals=0,
        bytes_accessed=BN * C * 4 + C * 3 * C * 2 + BN * 3 * C * 2)
    qkv = pl.pallas_call(
        _qkv_proj_kernel,
        out_shape=jax.ShapeDtypeStruct((BN, 3 * C), jnp.bfloat16),
        grid_spec=pltpu.PrefetchScalarGridSpec(
            num_scalar_prefetch=0,
            grid=(pl.cdiv(BN, rows),),
            in_specs=[
                pl.BlockSpec((rows, C), lambda r: (r, 0)),
                pl.BlockSpec((C, 3 * C), lambda r: (0, 0)),
            ],
            out_specs=pl.BlockSpec((rows, 3 * C), lambda r: (r, 0)),
        ),
        compiler_params=pltpu.CompilerParams(
            dimension_semantics=("parallel",),
            vmem_limit_bytes=k1_vmem),
        cost_estimate=cost_qkv,
    )(x2, wqkv_t)

    # ---- layout plumbing (plain XLA): head split; k pre-transposed ----
    # TODO(synk): this still round-trips the qkv intermediate through HBM once;
    # a BlockSpec view of (B, N, 3, H, hd) would need sub-sublane head blocks.
    qkv5 = qkv.reshape(B, N, 3, H, hd)
    q = jnp.transpose(qkv5[:, :, 0], (0, 2, 1, 3))    # (B, H, N, hd)  bf16
    kt = jnp.transpose(qkv5[:, :, 1], (0, 2, 3, 1))   # (B, H, hd, N)  bf16
    v = jnp.transpose(qkv5[:, :, 2], (0, 2, 1, 3))    # (B, H, N, hd)  bf16

    # ---- kernel 2: per-(batch, head) attention + accumulated projection ----
    attn_bytes = jnp.dtype(attn_dtype).itemsize
    k2_est = (2 * (3 * N * hd * 2 + hd * C * 2 + 2 * C * 4
                   + N * N * attn_bytes + N * C * 4)       # double-buffered blocks
              + N * C * 4                                   # acc scratch
              + 3 * N * N * 4 + 4 * N * hd * 4)             # in-kernel temporaries
    k2_vmem = int(max(8 << 20, min(56 << 20, 2 * k2_est)))
    cost_attn = pl.CostEstimate(
        flops=B * H * (4 * N * N * hd + 2 * N * hd * C),
        transcendentals=B * H * N * N,
        bytes_accessed=(3 * B * H * N * hd * 2 + B * H * hd * C * 2 + C * 4
                        + B * N * C * 4 + B * H * N * N * attn_bytes))
    out, attn = pl.pallas_call(
        _attn_kernel,
        out_shape=(
            jax.ShapeDtypeStruct((B, N, C), jnp.float32),
            jax.ShapeDtypeStruct((B, H, N, N), attn_dtype),
        ),
        grid_spec=pltpu.PrefetchScalarGridSpec(
            num_scalar_prefetch=0,
            grid=(B, H),
            in_specs=[
                pl.BlockSpec((1, 1, N, hd), lambda b, h: (b, h, 0, 0)),
                pl.BlockSpec((1, 1, hd, N), lambda b, h: (b, h, 0, 0)),
                pl.BlockSpec((1, 1, N, hd), lambda b, h: (b, h, 0, 0)),
                pl.BlockSpec((1, hd, C), lambda b, h: (h, 0, 0)),
                pl.BlockSpec((1, C), lambda b, h: (0, 0)),
            ],
            out_specs=[
                pl.BlockSpec((1, N, C), lambda b, h: (b, 0, 0)),        # resident over h
                pl.BlockSpec((1, 1, N, N), lambda b, h: (b, h, 0, 0)),
            ],
            scratch_shapes=[pltpu.VMEM((N, C), jnp.float32)],
        ),
        compiler_params=pltpu.CompilerParams(
            dimension_semantics=("parallel", "arbitrary"),
            vmem_limit_bytes=k2_vmem),
        cost_estimate=cost_attn,
    )(q, kt, v, wproj_r, bproj_2d)
    return out, attn


def _reference(x, wqkv, wproj, bproj, *, num_heads):
    """Plain-JAX f32 mirror of the PyTorch forward (for sanity checking)."""
    B, N, C = x.shape
    hd = C // num_heads
    scale = hd ** (-0.5)
    qkv = (x @ wqkv.T).reshape(B, N, 3, num_heads, hd).transpose(2, 0, 3, 1, 4)
    q, k, v = qkv[0], qkv[1], qkv[2]
    attn = jnp.einsum("bhnd,bhmd->bhnm", q, k) * scale
    attn = jax.nn.softmax(attn, axis=-1)
    o = jnp.einsum("bhnm,bhmd->bhnd", attn, v)
    o = o.transpose(0, 2, 1, 3).reshape(B, N, C)
    y = o @ wproj.T + bproj
    return y, attn


if __name__ == "__main__":
    B, N, C = 2, 16, 64
    num_heads = 8

    key = jax.random.PRNGKey(0)
    kx, kq, kp, kb = jax.random.split(key, 4)
    x = jax.random.normal(kx, (B, N, C), dtype=jnp.float32)
    # Deterministic synthetic parameters (shapes match nn.Linear: (out, in)).
    wqkv = jax.random.normal(kq, (3 * C, C), dtype=jnp.float32) * (C ** -0.5)
    wproj = jax.random.normal(kp, (C, C), dtype=jnp.float32) * (C ** -0.5)
    bproj = jax.random.normal(kb, (C,), dtype=jnp.float32) * 0.02

    out, attn = mhsa_forward(x, wqkv, wproj, bproj, num_heads=num_heads)
    jax.block_until_ready((out, attn))

    ref_out, ref_attn = _reference(x, wqkv, wproj, bproj, num_heads=num_heads)
    # Tolerances loosened for bf16 MXU operands (f32 accumulation retained).
    assert jnp.allclose(out, ref_out, atol=7e-2, rtol=7e-2)
    assert jnp.allclose(attn, ref_attn, atol=1e-2, rtol=5e-2)

    print("KERNEL_OK")
</pallas_src>

<mosaic_0001>
module attributes {stable_mosaic.version = 11 : i64} {
  func.func @_qkv_proj_kernel(%arg0: i32, %arg1: memref<32x64xf32, #tpu.memory_space<vmem>>, %arg2: memref<64x192xbf16, #tpu.memory_space<vmem>>, %arg3: memref<32x192xbf16, #tpu.memory_space<vmem>>) attributes {dimension_semantics = [#tpu.dimension_semantics<parallel>], iteration_bounds = array<i64: 1>, scalar_prefetch = 0 : i64, scratch_operands = 0 : i64, tpu.core_type = #tpu.core_type<tc>, window_params = [{transform_indices = @transform_0, window_bounds = array<i64: 32, 64>}, {pipeline_mode = #tpu.pipeline_mode<synchronous>, transform_indices = @transform_1, window_bounds = array<i64: 64, 192>}, {transform_indices = @transform_2, window_bounds = array<i64: 32, 192>}]} {
    %c0 = arith.constant 0 : index
    %c0_0 = arith.constant 0 : index
    %0 = vector.load %arg1[%c0, %c0_0] : memref<32x64xf32, #tpu.memory_space<vmem>>, vector<32x64xf32>
    %1 = arith.truncf %0 : vector<32x64xf32> to vector<32x64xbf16>
    %c0_1 = arith.constant 0 : index
    %c0_2 = arith.constant 0 : index
    %2 = vector.load %arg2[%c0_1, %c0_2] : memref<64x192xbf16, #tpu.memory_space<vmem>>, vector<64x192xbf16>
    %cst = arith.constant dense<0.000000e+00> : vector<32x192xf32>
    %3 = tpu.matmul %1, %2, %cst {dimension_numbers = #tpu.dot_dimension_numbers<[1], [0], [0], [1], [0, 0, 1, 1], [], []>} : vector<32x64xbf16>, vector<64x192xbf16>, vector<32x192xf32> -> vector<32x192xf32>
    %4 = arith.truncf %3 : vector<32x192xf32> to vector<32x192xbf16>
    %c0_3 = arith.constant 0 : index
    %c0_4 = arith.constant 0 : index
    %5 = vector.load %arg3[%c0_3, %c0_4] : memref<32x192xbf16, #tpu.memory_space<vmem>>, vector<32x192xbf16>
    tpu.vector_store %arg3[%c0_3, %c0_4], %4 {strides = array<i32>} : memref<32x192xbf16, #tpu.memory_space<vmem>>, vector<32x192xbf16>,
    return
  }
  func.func @transform_0(%arg0: i32) -> (i32, i32) {
    %c0_i32 = arith.constant 0 : i32
    %c0_i32_0 = arith.constant 0 : i32
    return %arg0, %c0_i32 : i32, i32
  }
  func.func @transform_1(%arg0: i32) -> (i32, i32) {
    %c0_i32 = arith.constant 0 : i32
    %c0_i32_0 = arith.constant 0 : i32
    %c0_i32_1 = arith.constant 0 : i32
    return %c0_i32, %c0_i32_0 : i32, i32
  }
  func.func @transform_2(%arg0: i32) -> (i32, i32) {
    %c0_i32 = arith.constant 0 : i32
    %c0_i32_0 = arith.constant 0 : i32
    return %arg0, %c0_i32 : i32, i32
  }
}

</mosaic_0001>

<bundles_post_ra>
// kernel: tpu_custom_call.1
= control target key start
LH: loop header
LB: loop body
LE: loop exit
PB: predicated region body
PF: predicated region fallthrough
CT: control target
= control target key end

     0   :  { %7 = vsyncpa [#allocation3], 0  ;;  %s398_s0 = inlined_call_operand.hbm [shape: f32[32,64], index: 0, kind: input, shape index: {}]   ;;  %s399_s1 = inlined_call_operand.hbm [shape: bf16[64,192], index: 1, kind: input, shape index: {}]   ;;  %s400_s2 = inlined_call_operand.hbm [shape: bf16[32,192], index: 2, kind: output, shape index: {}]  }
   0x1   :  { %8 = vsyncpa [#allocation6], 0 }
   0x2   :  { %9 = vsyncpa [#allocation4], 0  ;;  %s320_s9 = smov [#allocation2]   ;;  %s248_s13 = scalar_lea.hbm %s398_s0, 512 }
   0x3   :  { %s15_s10 = sshll.u32 %s320_s9, 4  ;;  %p249_p0 = scmp.ne.s32.totalorder %s398_s0, %s248_s13  ;;  %s16_s10 = int_to_ptr.vmem [resolvable:$true] %s15_s10 }
   0x4   :  { %p252_p1 = scmp.lt.u32.totalorder %s248_s13, %s398_s0 }
   0x6   :  { %p254_p2 = pnand %p252_p1, %p249_p0 }
   0x8   :  { %257 = shalt.err (!%p254_p2)
}
   0x9   :  { %s258_s18 = scalar_lea.vmem %s16_s10, 512  ;;  %p263_p4 = scmp.lt.s32.totalorder %s16_s10, %s16_s10 }
   0xa   :  { %p259_p3 = scmp.ne.s32.totalorder %s16_s10, %s258_s18  ;;  %p264_p5 = scmp.lt.s32.totalorder %s258_s18, %s258_s18 }
   0xc   :  { %p265_p6 = por %p264_p5, %p263_p4 }
   0xe   :  { %p266_p7 = pnand %p265_p6, %p259_p3 }
  0x10   :  { %269 = shalt.err (!%p266_p7)
}
  0x11   :  { %s321_s19 = smov 128   ;;  %s322_s20 = smov 8  }
  0x12   :  { %21 = dma.hbm_to_vmem [thread:$0]  %s398_s0, 512, %s16_s10, [#allocation3], %s321_s19, %s321_s19, %s322_s20  }
  0x13   :  { %s323_s23 = smov [#allocation5]   ;;  %s270_s27 = scalar_lea.hbm %s399_s1, 1024 }
  0x14   :  { %s27_s24 = sshll.u32 %s323_s23, 4  ;;  %p271_p8 = scmp.ne.s32.totalorder %s399_s1, %s270_s27  ;;  %s28_s24 = int_to_ptr.vmem [resolvable:$true] %s27_s24 }
  0x15   :  { %p274_p9 = scmp.lt.u32.totalorder %s270_s27, %s399_s1 }
  0x17   :  { %p276_p10 = pnand %p274_p9, %p271_p8 }
  0x19   :  { %279 = shalt.err (!%p276_p10)
}
  0x1a   :  { %s280_s4 = scalar_lea.vmem %s28_s24, 1024  ;;  %p285_p12 = scmp.lt.s32.totalorder %s28_s24, %s28_s24 }
  0x1b   :  { %p281_p11 = scmp.ne.s32.totalorder %s28_s24, %s280_s4  ;;  %p286_p13 = scmp.lt.s32.totalorder %s280_s4, %s280_s4 }
  0x1d   :  { %p287_p0 = por %p286_p13, %p285_p12 }
  0x1f   :  { %p288_p1 = pnand %p287_p0, %p281_p11 }
  0x21   :  { %291 = shalt.err (!%p288_p1)
}
  0x22   :  { %33 = dma.hbm_to_vmem [thread:$0]  %s399_s1, 1024, %s28_s24, [#allocation6], %s321_s19, %s321_s19, %s322_s20  }
  0x23   :  { %314 = dma.done.wait [#allocation3], 512  }
  0x24   :  { %315 = vsyncadd [#allocation3], 4294966784 }
  0x25   :  { %316 = dma.done.wait [#allocation6], 1024  }
  0x26   :  { %317 = vsyncadd [#allocation6], 4294966272  ;;  %v324_v0 = vmov 0   ;;  %v236_v1 = vld [vmem:[#allocation5 + $0x4] ss:$8 sps:$4 sm:$0xff]   ;;  %v43_v11 = vld [vmem:[#allocation2 + $0x10] sm:$0xff] }
  0x27   :  { %134 = vmatprep.mubr.bf16.mxu0 %v324_v0  ;;  %144 = vmatprep.mubr.bf16.mxu1 %v324_v0  ;;  %v238_v2 = vld [vmem:[#allocation5] ss:$8 sps:$4 sm:$0xff]   ;;  %v239_v3 = vld [vmem:[#allocation5 + $0x14] ss:$8 sps:$4 sm:$0xff]   ;;  %v241_v4 = vld [vmem:[#allocation5 + $0x10] ss:$8 sps:$4 sm:$0xff]  }
  0x28   :  { %102 = vmatprep.subr.bf16.mxu0 %v236_v1  ;;  %222 = vmatprep.subr.bf16.mxu1 %v236_v1  ;;  %v242_v5 = vld [vmem:[#allocation5 + $0x24] ss:$8 sps:$4 sm:$0xff]   ;;  %v244_v6 = vld [vmem:[#allocation5 + $0x20] ss:$8 sps:$4 sm:$0xff]   ;;  %v245_v7 = vld [vmem:[#allocation5 + $0x34] ss:$8 sps:$4 sm:$0xff]  }
  0x29   :  { %103 = vmatpush1.bf16.msra.mxu0 %v238_v2  ;;  %226 = vmatpush1.bf16.msra.mxu1 %v238_v2  ;;  %v247_v8 = vld [vmem:[#allocation5 + $0x30] ss:$8 sps:$4 sm:$0xff]   ;;  %v41_v9 = vld [vmem:[#allocation2] sm:$0xff]  ;;  %v42_v10 = vld [vmem:[#allocation2 + $0x8] sm:$0xff]  ;;  %vm95_vm0 = vcmask 523264   ;;  %vm179_vm1 = vcmask 1043456  }
  0x2a   :  { %104 = vmatprep.subr.bf16.mxu0 %v239_v3  ;;  %223 = vmatprep.subr.bf16.mxu1 %v239_v3  ;;  %v44_v12 = vld [vmem:[#allocation2 + $0x18] sm:$0xff]  ;;  %v45_v13 = vpack.c.bf16 %v42_v10, %v41_v9  ;;  %vm180_vm2 = vcmask 523268   ;;  %s325_s1 = smov [#allocation7]  }
  0x2b   :  { %v46_v14 = vpack.c.bf16 %v44_v12, %v43_v11  ;;  %vm371_vm3 = vmor %vm180_vm2, %vm179_vm1  ;;  %s191_s6 = sshll.u32 %s325_s1, 4  ;;  %s192_s6 = int_to_ptr.vmem [resolvable:$true] %s191_s6 }
  0x2c   :  { %s292_s7 = scalar_lea.vmem %s192_s6, 512  ;;  %p297_p3 = scmp.lt.s32.totalorder %s192_s6, %s192_s6 }
  0x2d   :  { %105 = vmatpush1.bf16.msra.mxu0 %v241_v4  ;;  %227 = vmatpush1.bf16.msra.mxu1 %v241_v4  ;;  %p293_p2 = scmp.ne.s32.totalorder %s192_s6, %s292_s7  ;;  %p298_p4 = scmp.lt.s32.totalorder %s292_s7, %s292_s7 }
  0x2e   :  { %106 = vmatprep.subr.bf16.mxu0 %v242_v5  ;;  %224 = vmatprep.subr.bf16.mxu1 %v242_v5 }
  0x2f   :  { %p299_p5 = por %p298_p4, %p297_p3 }
  0x31   :  { %107 = vmatpush1.bf16.msra.mxu0 %v244_v6  ;;  %228 = vmatpush1.bf16.msra.mxu1 %v244_v6  ;;  %p300_p6 = pnand %p299_p5, %p293_p2 }
  0x32   :  { %108 = vmatprep.subr.bf16.mxu0 %v245_v7  ;;  %225 = vmatprep.subr.bf16.mxu1 %v245_v7 }
  0x35   :  { %109 = vmatpush1.bf16.msra.mxu0 %v247_v8  ;;  %229 = vmatpush1.bf16.msra.mxu1 %v247_v8 }
  0x38   :  { %212 = vmatmul.mubr.msk.bf16.vlgmr.msra.gmra.mrb[0].mxu0 %vm95_vm0, %v45_v13  ;;  %213 = vmatmul.mubr.msk.bf16.vlgmr.msra.gmra.mrb[0].mxu1 %vm95_vm0, %v46_v14 }
 0x10b   :  { %v136_v15 = vpop.f32.mrb[0].mxu0  ;;  %v146_v16 = vpop.f32.mrb[0].mxu1 }
 0x10c   :  { %v138_v17 = vpop.f32.mrb[1].mxu0  ;;  %v148_v19 = vpop.f32.mrb[1].mxu1 }
 0x10d   :  { %v218_v20 = vpack.c.bf16 %v138_v17, %v136_v15  ;;  %v220_v21 = vpack.c.bf16 %v148_v19, %v146_v16  ;;  %v140_v22 = vpop.f32.mrb[2].mxu0  ;;  %v150_v23 = vpop.f32.mrb[2].mxu1 }
 0x10e   :  { %v142_v24 = vpop.f32.mrb[3].mxu0  ;;  %v152_v25 = vpop.f32.mrb[3].mxu1 }
 0x10f   :  { %182 = vst.msk [vmem:[#allocation7] sm:$0xff] %vm371_vm3, %v218_v20  ;;  %184 = vst.msk [vmem:[#allocation7 + $0x10] sm:$0xff] %vm371_vm3, %v220_v21  ;;  %v219_v26 = vpack.c.bf16 %v142_v24, %v140_v22  ;;  %v221_v27 = vpack.c.bf16 %v152_v25, %v150_v23 }
 0x111   :  { %183 = vst.msk [vmem:[#allocation7 + $0x8] sm:$0xff] %vm371_vm3, %v219_v26  ;;  %185 = vst.msk [vmem:[#allocation7 + $0x18] sm:$0xff] %vm371_vm3, %v221_v27 }
 0x112   :  { %303 = shalt.err (!%p300_p6)
}
 0x113   :  { %s304_s10 = scalar_lea.hbm %s400_s2, 512 }
 0x114   :  { %p305_p7 = scmp.ne.s32.totalorder %s400_s2, %s304_s10  ;;  %p308_p8 = scmp.lt.u32.totalorder %s304_s10, %s400_s2 }
 0x116   :  { %p310_p9 = pnand %p308_p8, %p305_p7 }
 0x118   :  { %313 = shalt.err (!%p310_p9)
}
 0x119   :  { %197 = dma.vmem_to_hbm [thread:$0]  %s192_s6, 512, %s400_s2, [#allocation4], %s321_s19, %s321_s19, %s322_s20  }
 0x11a   :  { %318 = dma.done.wait [#allocation4], 512  }
 0x11b   :  { %319 = vsyncadd [#allocation4], 4294966784 }
 0x11c   :  { %201 = vsyncpa [#allocation3], 1 }
 0x11d   :  { %202 = vsyncpa [#allocation6], 1 }
 0x11e   :  { %203 = vsyncpa [#allocation4], 1 }

</bundles_post_ra>
